<compile_context>
chip_gen: v7x
topology: tpu7x:2x2x1
jax: 0.10.0
libtpu: 0.0.40
codegen_flags: <defaults>
</compile_context>

<pallas_src>
import jax
import jax.numpy as jnp
from jax.experimental import pallas as pl
from jax.experimental.pallas import tpu as pltpu

_SUBLANE = 8
_LANE = 128


def _round_up(x, m):
    return (x + m - 1) // m * m


def qnet_kernel(x_ref, w1_ref, b1_ref, w2_ref, b2_ref, w3_ref, b3_ref, out_ref):
    # fc1 + relu: MXU matmul (operand dtype = compute dtype, f32 accumulation),
    # bias add + ReLU on the VPU in f32.
    h1 = jnp.dot(x_ref[...], w1_ref[...], preferred_element_type=jnp.float32)
    h1 = jnp.maximum(h1 + b1_ref[...], 0.0)
    # fc2 + relu
    h2 = jnp.dot(h1.astype(w2_ref.dtype), w2_ref[...],
                 preferred_element_type=jnp.float32)
    h2 = jnp.maximum(h2 + b2_ref[...], 0.0)
    # fc3 (no activation); output is lane-padded to 128 -> full-lane store.
    out = jnp.dot(h2.astype(w3_ref.dtype), w3_ref[...],
                  preferred_element_type=jnp.float32)
    out_ref[...] = (out + b3_ref[...]).astype(out_ref.dtype)


def qnetwork_forward(x, params, *, batch_tile=None, compute_dtype=jnp.bfloat16):
    """Run the QNetwork forward pass via one Pallas kernel.

    x: (B, state_dim) float32
    params: dict with w1 (state,hidden), b1 (1,hidden), w2 (hidden,hidden),
            b2 (1,hidden), w3 (hidden,action), b3 (1,action)
    compute_dtype: matmul operand dtype (bf16 recommended on v6e/v7x; the
            bias/ReLU/accumulation path stays float32 on every generation).
    """
    w1, b1, w2, b2, w3, b3 = (params[k] for k in ("w1", "b1", "w2", "b2", "w3", "b3"))
    B, state_dim = x.shape
    hidden_dim = w1.shape[1]
    action_dim = w3.shape[1]

    # ---- lane-dense output: pad action_dim up to a multiple of 128 so the last
    # matmul produces full 128-lane tiles and the writeback is an unmasked vst.
    a_pad = _round_up(action_dim, _LANE)
    if a_pad != action_dim:
        w3 = jnp.pad(w3, ((0, 0), (0, a_pad - action_dim)))
        b3 = jnp.pad(b3, ((0, 0), (0, a_pad - action_dim)))

    # ---- batch tile: big enough to amortize the ~0.35us/step overhead, >= 2
    # grid steps when possible (pipelining + both v7x TCs), capped at 1024 rows
    # so the double-buffered x/out tiles stay ~1 MiB on every VMEM generation.
    if batch_tile is None:
        tb = min(1024, _round_up(pl.cdiv(B, 2), _SUBLANE))
    else:
        tb = max(_SUBLANE, _round_up(batch_tile, _SUBLANE))
    b_pad = _round_up(B, tb)
    grid = (b_pad // tb,)

    # Cast matmul operands; a real agent would keep a bf16 copy of the weights
    # resident instead of re-casting every call.
    cd = jnp.dtype(compute_dtype)
    xp = x.astype(cd)
    if b_pad != B:
        xp = jnp.pad(xp, ((0, b_pad - B), (0, 0)))
    w1c, w2c, w3c = (w.astype(cd) for w in (w1, w2, w3))
    b1f, b2f, b3f = (b.astype(jnp.float32) for b in (b1, b2, b3))

    # Grid-invariant operands -> single VMEM buffer (no double-buffering).
    def const_spec(shape):
        return pl.BlockSpec(shape, lambda i: (0, 0), pipeline_mode=pl.Buffered(1))

    itemsize = cd.itemsize
    weight_bytes = ((w1c.size + w2c.size + w3c.size) * itemsize
                    + (b1f.size + b2f.size + b3f.size) * 4)
    cost = pl.CostEstimate(
        flops=2 * b_pad * (state_dim * hidden_dim
                           + hidden_dim * hidden_dim
                           + hidden_dim * a_pad),
        transcendentals=0,
        bytes_accessed=b_pad * state_dim * itemsize + weight_bytes + b_pad * a_pad * 4,
    )

    # Per-call VMEM: double-buffered x/out tiles + single-buffered weights
    # (+ headroom).  Explicit limit raises v5e's 16 MiB default and stays well
    # inside v7x's 64 MiB physical VMEM.
    vmem_need = 2 * (tb * state_dim * itemsize + tb * a_pad * 4) + weight_bytes + (2 << 20)
    vmem_limit = int(min(max(vmem_need, 16 << 20), 32 << 20))

    out_padded = pl.pallas_call(
        qnet_kernel,
        out_shape=jax.ShapeDtypeStruct((b_pad, a_pad), jnp.float32),
        grid_spec=pltpu.PrefetchScalarGridSpec(
            num_scalar_prefetch=0,
            grid=grid,
            in_specs=[
                pl.BlockSpec((tb, state_dim), lambda i: (i, 0)),  # x tile (pipelined)
                const_spec((state_dim, hidden_dim)),              # w1
                const_spec((1, hidden_dim)),                      # b1
                const_spec((hidden_dim, hidden_dim)),             # w2
                const_spec((1, hidden_dim)),                      # b2
                const_spec((hidden_dim, a_pad)),                  # w3 (lane-padded)
                const_spec((1, a_pad)),                           # b3 (lane-padded)
            ],
            out_specs=pl.BlockSpec((tb, a_pad), lambda i: (i, 0)),
        ),
        compiler_params=pltpu.CompilerParams(
            dimension_semantics=("parallel",),
            vmem_limit_bytes=vmem_limit,
        ),
        cost_estimate=cost,
    )(xp, w1c, b1f, w2c, b2f, w3c, b3f)

    return out_padded[:B, :action_dim]


def init_params(key, state_dim, action_dim, hidden_dim=128):
    """Deterministic init mimicking nn.Linear default: U(-1/sqrt(fan_in), 1/sqrt(fan_in))."""
    ks = jax.random.split(key, 6)

    def linear(kw, kb, fan_in, fan_out):
        bound = 1.0 / jnp.sqrt(jnp.float32(fan_in))
        w = jax.random.uniform(kw, (fan_in, fan_out), jnp.float32, -bound, bound)
        b = jax.random.uniform(kb, (1, fan_out), jnp.float32, -bound, bound)
        return w, b

    w1, b1 = linear(ks[0], ks[1], state_dim, hidden_dim)
    w2, b2 = linear(ks[2], ks[3], hidden_dim, hidden_dim)
    w3, b3 = linear(ks[4], ks[5], hidden_dim, action_dim)
    return {"w1": w1, "b1": b1, "w2": w2, "b2": b2, "w3": w3, "b3": b3}


def qnetwork_ref(x, p, compute_dtype=jnp.float32):
    """Plain-JAX reference with the same operand-dtype policy as the kernel."""
    cd = jnp.dtype(compute_dtype)
    w1, w2, w3 = (p[k].astype(cd) for k in ("w1", "w2", "w3"))
    b1, b2, b3 = (p[k].astype(jnp.float32) for k in ("b1", "b2", "b3"))
    h1 = jnp.maximum(jnp.dot(x.astype(cd), w1, preferred_element_type=jnp.float32) + b1, 0.0)
    h2 = jnp.maximum(jnp.dot(h1.astype(cd), w2, preferred_element_type=jnp.float32) + b2, 0.0)
    return jnp.dot(h2.astype(cd), w3, preferred_element_type=jnp.float32) + b3


if __name__ == "__main__":
    state_dim, action_dim, hidden_dim = 16, 8, 128
    batch = 16  # small; splits into two 8-row tiles -> exercises the pipelined grid

    key = jax.random.PRNGKey(0)
    kx, kp = jax.random.split(key)
    x = jax.random.normal(kx, (batch, state_dim), dtype=jnp.float32)
    params = init_params(kp, state_dim, action_dim, hidden_dim)

    # f32-operand path: tight check against the plain-JAX reference.
    out_f32 = jax.block_until_ready(qnetwork_forward(x, params, compute_dtype=jnp.float32))
    ref_f32 = qnetwork_ref(x, params, compute_dtype=jnp.float32)
    assert out_f32.shape == (batch, action_dim)
    assert jnp.allclose(out_f32, ref_f32, atol=1e-5, rtol=1e-5)

    # default bf16-operand path (f32 accumulation): check against the matching reference.
    out_bf16 = jax.block_until_ready(qnetwork_forward(x, params))
    ref_bf16 = qnetwork_ref(x, params, compute_dtype=jnp.bfloat16)
    assert out_bf16.shape == (batch, action_dim)
    assert jnp.allclose(out_bf16, ref_bf16, atol=5e-2, rtol=5e-2)

    print("KERNEL_OK")
</pallas_src>

<mosaic_0001>
module attributes {stable_mosaic.version = 11 : i64} {
  func.func @qnet_kernel(%arg0: i32, %arg1: memref<8x16xf32, #tpu.memory_space<vmem>>, %arg2: memref<16x128xf32, #tpu.memory_space<vmem>>, %arg3: memref<1x128xf32, #tpu.memory_space<vmem>>, %arg4: memref<128x128xf32, #tpu.memory_space<vmem>>, %arg5: memref<1x128xf32, #tpu.memory_space<vmem>>, %arg6: memref<128x128xf32, #tpu.memory_space<vmem>>, %arg7: memref<1x128xf32, #tpu.memory_space<vmem>>, %arg8: memref<8x128xf32, #tpu.memory_space<vmem>>) attributes {dimension_semantics = [#tpu.dimension_semantics<parallel>], iteration_bounds = array<i64: 2>, scalar_prefetch = 0 : i64, scratch_operands = 0 : i64, tpu.core_type = #tpu.core_type<tc>, window_params = [{transform_indices = @transform_0, window_bounds = array<i64: 8, 16>}, {pipeline_mode = #tpu.pipeline_mode<synchronous>, transform_indices = @transform_1, window_bounds = array<i64: 16, 128>}, {pipeline_mode = #tpu.pipeline_mode<synchronous>, transform_indices = @transform_2, window_bounds = array<i64: 1, 128>}, {pipeline_mode = #tpu.pipeline_mode<synchronous>, transform_indices = @transform_3, window_bounds = array<i64: 128, 128>}, {pipeline_mode = #tpu.pipeline_mode<synchronous>, transform_indices = @transform_4, window_bounds = array<i64: 1, 128>}, {pipeline_mode = #tpu.pipeline_mode<synchronous>, transform_indices = @transform_5, window_bounds = array<i64: 128, 128>}, {pipeline_mode = #tpu.pipeline_mode<synchronous>, transform_indices = @transform_6, window_bounds = array<i64: 1, 128>}, {transform_indices = @transform_7, window_bounds = array<i64: 8, 128>}]} {
    %c0 = arith.constant 0 : index
    %c0_0 = arith.constant 0 : index
    %0 = vector.load %arg1[%c0, %c0_0] : memref<8x16xf32, #tpu.memory_space<vmem>>, vector<8x16xf32>
    %c0_1 = arith.constant 0 : index
    %c0_2 = arith.constant 0 : index
    %1 = vector.load %arg2[%c0_1, %c0_2] : memref<16x128xf32, #tpu.memory_space<vmem>>, vector<16x128xf32>
    %cst = arith.constant dense<0.000000e+00> : vector<8x128xf32>
    %2 = tpu.matmul %0, %1, %cst {dimension_numbers = #tpu.dot_dimension_numbers<[1], [0], [0], [1], [0, 0, 1, 1], [], []>} : vector<8x16xf32>, vector<16x128xf32>, vector<8x128xf32> -> vector<8x128xf32>
    %c0_3 = arith.constant 0 : index
    %c0_4 = arith.constant 0 : index
    %3 = vector.load %arg3[%c0_3, %c0_4] : memref<1x128xf32, #tpu.memory_space<vmem>>, vector<1x128xf32>
    %4 = vector.broadcast %3 : vector<1x128xf32> to vector<8x128xf32>
    %5 = arith.addf %2, %4 : vector<8x128xf32>
    %cst_5 = arith.constant 0.000000e+00 : f32
    %6 = vector.broadcast %cst_5 : f32 to vector<8x128xf32>
    %7 = arith.maximumf %5, %6 : vector<8x128xf32>
    %c0_6 = arith.constant 0 : index
    %c0_7 = arith.constant 0 : index
    %8 = vector.load %arg4[%c0_6, %c0_7] : memref<128x128xf32, #tpu.memory_space<vmem>>, vector<128x128xf32>
    %cst_8 = arith.constant dense<0.000000e+00> : vector<8x128xf32>
    %9 = tpu.matmul %7, %8, %cst_8 {dimension_numbers = #tpu.dot_dimension_numbers<[1], [0], [0], [1], [0, 0, 1, 1], [], []>} : vector<8x128xf32>, vector<128x128xf32>, vector<8x128xf32> -> vector<8x128xf32>
    %c0_9 = arith.constant 0 : index
    %c0_10 = arith.constant 0 : index
    %10 = vector.load %arg5[%c0_9, %c0_10] : memref<1x128xf32, #tpu.memory_space<vmem>>, vector<1x128xf32>
    %11 = vector.broadcast %10 : vector<1x128xf32> to vector<8x128xf32>
    %12 = arith.addf %9, %11 : vector<8x128xf32>
    %cst_11 = arith.constant 0.000000e+00 : f32
    %13 = vector.broadcast %cst_11 : f32 to vector<8x128xf32>
    %14 = arith.maximumf %12, %13 : vector<8x128xf32>
    %c0_12 = arith.constant 0 : index
    %c0_13 = arith.constant 0 : index
    %15 = vector.load %arg6[%c0_12, %c0_13] : memref<128x128xf32, #tpu.memory_space<vmem>>, vector<128x128xf32>
    %cst_14 = arith.constant dense<0.000000e+00> : vector<8x128xf32>
    %16 = tpu.matmul %14, %15, %cst_14 {dimension_numbers = #tpu.dot_dimension_numbers<[1], [0], [0], [1], [0, 0, 1, 1], [], []>} : vector<8x128xf32>, vector<128x128xf32>, vector<8x128xf32> -> vector<8x128xf32>
    %c0_15 = arith.constant 0 : index
    %c0_16 = arith.constant 0 : index
    %17 = vector.load %arg7[%c0_15, %c0_16] : memref<1x128xf32, #tpu.memory_space<vmem>>, vector<1x128xf32>
    %18 = vector.broadcast %17 : vector<1x128xf32> to vector<8x128xf32>
    %19 = arith.addf %16, %18 : vector<8x128xf32>
    %c0_17 = arith.constant 0 : index
    %c0_18 = arith.constant 0 : index
    %20 = vector.load %arg8[%c0_17, %c0_18] : memref<8x128xf32, #tpu.memory_space<vmem>>, vector<8x128xf32>
    tpu.vector_store %arg8[%c0_17, %c0_18], %19 {strides = array<i32>} : memref<8x128xf32, #tpu.memory_space<vmem>>, vector<8x128xf32>,
    return
  }
  func.func @transform_0(%arg0: i32) -> (i32, i32) {
    %c0_i32 = arith.constant 0 : i32
    %c0_i32_0 = arith.constant 0 : i32
    return %arg0, %c0_i32 : i32, i32
  }
  func.func @transform_1(%arg0: i32) -> (i32, i32) {
    %c0_i32 = arith.constant 0 : i32
    %c0_i32_0 = arith.constant 0 : i32
    %c0_i32_1 = arith.constant 0 : i32
    return %c0_i32, %c0_i32_0 : i32, i32
  }
  func.func @transform_2(%arg0: i32) -> (i32, i32) {
    %c0_i32 = arith.constant 0 : i32
    %c0_i32_0 = arith.constant 0 : i32
    %c0_i32_1 = arith.constant 0 : i32
    return %c0_i32, %c0_i32_0 : i32, i32
  }
  func.func @transform_3(%arg0: i32) -> (i32, i32) {
    %c0_i32 = arith.constant 0 : i32
    %c0_i32_0 = arith.constant 0 : i32
    %c0_i32_1 = arith.constant 0 : i32
    return %c0_i32, %c0_i32_0 : i32, i32
  }
  func.func @transform_4(%arg0: i32) -> (i32, i32) {
    %c0_i32 = arith.constant 0 : i32
    %c0_i32_0 = arith.constant 0 : i32
    %c0_i32_1 = arith.constant 0 : i32
    return %c0_i32, %c0_i32_0 : i32, i32
  }
  func.func @transform_5(%arg0: i32) -> (i32, i32) {
    %c0_i32 = arith.constant 0 : i32
    %c0_i32_0 = arith.constant 0 : i32
    %c0_i32_1 = arith.constant 0 : i32
    return %c0_i32, %c0_i32_0 : i32, i32
  }
  func.func @transform_6(%arg0: i32) -> (i32, i32) {
    %c0_i32 = arith.constant 0 : i32
    %c0_i32_0 = arith.constant 0 : i32
    %c0_i32_1 = arith.constant 0 : i32
    return %c0_i32, %c0_i32_0 : i32, i32
  }
  func.func @transform_7(%arg0: i32) -> (i32, i32) {
    %c0_i32 = arith.constant 0 : i32
    %c0_i32_0 = arith.constant 0 : i32
    return %arg0, %c0_i32 : i32, i32
  }
}

</mosaic_0001>

<bundles_post_ra>
// kernel: tpu_custom_call.1
= control target key start
LH: loop header
LB: loop body
LE: loop exit
PB: predicated region body
PF: predicated region fallthrough
CT: control target
= control target key end

     0   :  { %12 = vsyncpa [#allocation3], 0  ;;  %s1529_s0 = inlined_call_operand.hbm [shape: f32[16,16], index: 0, kind: input, shape index: {}]   ;;  %s1530_s1 = inlined_call_operand.hbm [shape: f32[16,128], index: 1, kind: input, shape index: {}]   ;;  %s1531_s2 = inlined_call_operand.vmem [shape: f32[1,128], index: 2, kind: input, shape index: {}]   ;;  %s1532_s3 = inlined_call_operand.hbm [shape: f32[128,128], index: 3, kind: input, shape index: {}]   ;;  %s1533_s4 = inlined_call_operand.vmem [shape: f32[1,128], index: 4, kind: input, shape index: {}]   ;;  %s1534_s5 = inlined_call_operand.hbm [shape: f32[128,128], index: 5, kind: input, shape index: {}]   ;;  %s1535_s6 = inlined_call_operand.vmem [shape: f32[1,128], index: 6, kind: input, shape index: {}]   ;;  %s1536_s7 = inlined_call_operand.hbm [shape: f32[16,128], index: 7, kind: output, shape index: {}]  }
   0x1   :  { %14 = vsyncpa [#allocation3 + $0x1], 0 }
   0x2   :  { %15 = vsyncpa [#allocation6], 0 }
   0x3   :  { %16 = vsyncpa [#allocation9], 0 }
   0x4   :  { %17 = vsyncpa [#allocation4], 0 }
   0x5   :  { %19 = vsyncpa [#allocation4 + $0x1], 0  ;;  %s1233_s24 = smov 0   ;;  %s1235_s25 = smov 0  }
   0x6   :  { %s1237_s26 = smov 0   ;;  %s1239_s27 = smov 0  }
   0x7 LB: > { %s1254_s28 = sadd.s32 4294967295, %s1181_s27   ;;  %s724_s29 = sadd.s32 4294967294, %s1181_s27   ;;  %s1181_s27 = sphi %s1239_s27, %s1562_s27   ;;  %s1177_s26 = sphi %s1237_s26, %s1561_s26   ;;  %s1173_s25 = sphi %s1235_s25, %s1560_s25   ;;  %s1169_s24 = sphi %s1233_s24, %s1559_s24  }
   0x8   : > { %p45_p0 = scmp.ne.s32.totalorder %s1173_s25, %s1169_s24  ;;  %p1537_p1 = scmp.eq.s32.totalorder %s1254_s28, 0 }
   0x9   : > { %p201_p3 = scmp.eq.s32.totalorder %s724_s29, 1  ;;  %p725_p5 = scmp.ge.s32.totalorder %s1181_s27, 1 }
   0xa   : > { %p1263_p4 = por %p1537_p1, %p45_p0  ;;  %p208_p7 = scmp.lt.s32.totalorder %s1181_s27, 3 }
   0xb   : > { %p1268_p6 = por %p201_p3, %p45_p0  ;;  %s1183_s10 = smov [#allocation5]  }
   0xc   : > { %s1541_s30 = scalar_select %p1263_p4, 1, 0 }
   0xd   : > { %s1542_s8 = scalar_select %p1268_p6, 1, 0 }
   0xe   : > { %p1273_p8 = pnand %p725_p5, %p208_p7  ;;  %s220_s11 = sshll.u32 %s1183_s10, 4  ;;  %s1277_s11 = int_to_ptr.vmem [resolvable:$true] %s220_s11 }
   0xf   : > { %1543 = sst [smem:[#allocation15_spill]] %s1542_s8  ;;  %s1184_s13 = smov [#allocation7]  }
  0x10   : > { %s1544_s9 = scalar_select %p1273_p8, 1, 0 }
  0x11   : > { %p927_p9 = pneg %p1273_p8  ;;  %s236_s14 = sshll.u32 %s1184_s13, 4  ;;  %s1288_s14 = int_to_ptr.vmem [resolvable:$true] %s236_s14 }
  0x12   : > { %s1185_s15 = smov [#allocation8]   ;;  %s993_s19 = scalar_lea.hbm %s1530_s1, 256 }
  0x13   : > { %p1284_p11 = pnand %p927_p9, %p1537_p1  ;;  %s1290_s16 = sshll.u32 %s1185_s15, 4  ;;  %s253_s16 = int_to_ptr.vmem [resolvable:$true] %s1290_s16 }
  0x14   : > { %p994_p12 = scmp.ne.s32.totalorder %s1530_s1, %s993_s19  ;;  %p1000_p5 = scmp.lt.u32.totalorder %s993_s19, %s1530_s1 }
  0x15   : > { %p1300_p13 = pneg %p1284_p11 }
  0x17   : > { %p996_p0 = pnand %p1300_p13, %p994_p12 }
  0x19   : > { %p997_p3 = pneg %p996_p0 }
  0x1b   : > { %p1002_p7 = pnand %p1000_p5, %p997_p3 }
  0x1d   : > { %1005 = shalt.err (!%p1002_p7)
}
  0x1e   : > { %s1006_s10 = scalar_lea.vmem %s1277_s11, 256  ;;  %p1014_p2 = scmp.lt.s32.totalorder %s1277_s11, %s1277_s11 }
  0x1f   : > { %p1007_p9 = scmp.ne.s32.totalorder %s1277_s11, %s1006_s10  ;;  %p1015_p6 = scmp.lt.s32.totalorder %s1006_s10, %s1006_s10 }
  0x21   : > { %p1009_p10 = pnand %p1007_p9, %p1300_p13  ;;  %p1016_p12 = por %p1015_p6, %p1014_p2 }
  0x23   : > { %p1010_p1 = pneg %p1009_p10 }
  0x25   : > { %p1017_p0 = pnand %p1016_p12, %p1010_p1 }
  0x27   : > { %1020 = shalt.err (!%p1017_p0)
}
  0x28   : > { %s1186_s13 = smov 128   ;;  %s1187_s15 = smov 8  }
  0x29   : > { %930 = dma.hbm_to_vmem [thread:$0]  (!%p1284_p11), %s1530_s1, 256, %s1277_s11, [#allocation6], %s1186_s13, %s1186_s13, %s1187_s15  }
  0x2a   : > { %s1021_s21 = scalar_lea.hbm %s1532_s3, 2048 }
  0x2b   : > { %p1022_p1 = scmp.ne.s32.totalorder %s1532_s3, %s1021_s21  ;;  %p1028_p10 = scmp.lt.u32.totalorder %s1021_s21, %s1532_s3 }
  0x2d   : > { %p1024_p2 = pnand %p1022_p1, %p1300_p13 }
  0x2f   : > { %p1025_p6 = pneg %p1024_p2 }
  0x31   : > { %p1030_p3 = pnand %p1028_p10, %p1025_p6 }
  0x33   : > { %1033 = shalt.err (!%p1030_p3)
}
  0x34   : > { %s1034_s11 = scalar_lea.vmem %s1288_s14, 2048  ;;  %p1042_p12 = scmp.lt.s32.totalorder %s1288_s14, %s1288_s14 }
  0x35   : > { %p1035_p5 = scmp.ne.s32.totalorder %s1288_s14, %s1034_s11  ;;  %p1043_p0 = scmp.lt.s32.totalorder %s1034_s11, %s1034_s11 }
  0x37   : > { %p1037_p7 = pnand %p1035_p5, %p1300_p13  ;;  %p1044_p1 = por %p1043_p0, %p1042_p12 }
  0x39   : > { %p1038_p9 = pneg %p1037_p7 }
  0x3b   : > { %p1045_p2 = pnand %p1044_p1, %p1038_p9 }
  0x3d   : > { %1048 = shalt.err (!%p1045_p2)
}
  0x3e   : > { %933 = dma.hbm_to_vmem [thread:$0]  (!%p1284_p11), %s1532_s3, 2048, %s1288_s14, [#allocation6], %s1186_s13, %s1186_s13, %s1187_s15  }
  0x3f   : > { %s1049_s20 = scalar_lea.hbm %s1534_s5, 2048 }
  0x40   : > { %p1050_p6 = scmp.ne.s32.totalorder %s1534_s5, %s1049_s20  ;;  %p1056_p5 = scmp.lt.u32.totalorder %s1049_s20, %s1534_s5 }
  0x42   : > { %p1052_p10 = pnand %p1050_p6, %p1300_p13 }
  0x44   : > { %p1053_p3 = pneg %p1052_p10 }
  0x46   : > { %p1058_p7 = pnand %p1056_p5, %p1053_p3 }
  0x48   : > { %1061 = shalt.err (!%p1058_p7)
}
  0x49   : > { %s1062_s11 = scalar_lea.vmem %s253_s16, 2048  ;;  %p1070_p1 = scmp.lt.s32.totalorder %s253_s16, %s253_s16 }
  0x4a   : > { %p1063_p9 = scmp.ne.s32.totalorder %s253_s16, %s1062_s11  ;;  %p1071_p2 = scmp.lt.s32.totalorder %s1062_s11, %s1062_s11 }
  0x4c   : > { %p1065_p12 = pnand %p1063_p9, %p1300_p13  ;;  %p1072_p4 = por %p1071_p2, %p1070_p1 }
  0x4e   : > { %p1066_p0 = pneg %p1065_p12 }
  0x50   : > { %p1073_p8 = pnand %p1072_p4, %p1066_p0 }
  0x52   : > { %1076 = shalt.err (!%p1073_p8)
}
  0x53   : > { %936 = dma.hbm_to_vmem [thread:$0]  (!%p1284_p11), %s1534_s5, 2048, %s253_s16, [#allocation9], %s1186_s13, %s1186_s13, %s1187_s15  }
  0x54   : > { %s1373_s22 = sadd.s32 1, %s1181_s27   ;;  %s32_s17 = sadd.s32 1, %s1177_s26 }
  0x55   : > { %s29_s12 = ssub.s32 %s1181_s27, %s1373_s22  ;;  %p39_p8 = scmp.ne.s32.totalorder %s1177_s26, %s1173_s25 }
  0x56   : > { %p30_p4 = scmp.eq.s32.totalorder %s29_s12, 0  ;;  %p40_p13 = scmp.eq.s32.totalorder %s1181_s27, 0 }
  0x57   : > { %p948_p6 = scmp.lt.s32.totalorder %s1181_s27, 2  ;;  %p1547_p3 = scmp.eq.s32.totalorder %s1254_s28, 1 }
  0x58   : > { %s1383_s18 = scalar_select %p30_p4, %s1177_s26, %s32_s17  }
  0x59   : > { %p41_p10 = por %p40_p13, %p39_p8  ;;  %p1387_p5 = por %p1547_p3, %p39_p8 }
  0x5a   : > { %s269_s20 = sand.u32 1, %s1177_s26   ;;  %s731_s21 = sshll.u32 %s1181_s27, 7 }
  0x5b   : > { %s730_s16 = sshll.u32 %s269_s20, 3  ;;  %s1396_s23 = scalar_lea.hbm %s1529_s0, %s731_s21 }
  0x5c   : > { %s273_s29 = scalar_lea.vmem [#allocation2], %s730_s16  ;;  %p1398_p11 = pnand %p948_p6, %p41_p10 }
  0x5d   : > { %s280_s10 = sshll.u32 %s273_s29, 4  ;;  %s270_s14 = scalar_lea.sflag [#allocation3], %s269_s20  ;;  %s1402_s10 = int_to_ptr.vmem [resolvable:$true] %s280_s10 }
  0x5e   : > { %s1077_s8 = scalar_lea.hbm %s1396_s23, 128  ;;  %p1079_p9 = pneg %p1398_p11 }
  0x5f   : > { %p1078_p7 = scmp.ne.s32.totalorder %s1396_s23, %s1077_s8  ;;  %s1082_s21 = scalar_lea.hbm %s1529_s0, 256 }
  0x60   : > { %p1083_p1 = scmp.lt.u32.totalorder %s1396_s23, %s1529_s0  ;;  %p1084_p2 = scmp.lt.u32.totalorder %s1082_s21, %s1077_s8 }
  0x61   : > { %p1080_p12 = pnand %p1079_p9, %p1078_p7  ;;  %p1086_p8 = scmp.lt.u32.totalorder %s1077_s8, %s1396_s23 }
  0x62   : > { %p1085_p4 = por %p1084_p2, %p1083_p1 }
  0x63   : > { %p1081_p0 = pneg %p1080_p12 }
  0x64   : > { %p1087_p13 = por %p1086_p8, %p1085_p4 }
  0x66   : > { %p1088_p6 = pnand %p1087_p13, %p1081_p0 }
  0x68   : > { %1091 = shalt.err (!%p1088_p6)
}
  0x69   : > { %s1092_s20 = scalar_lea.vmem %s1402_s10, 128  ;;  %s1188_s15 = smov [#allocation2]  }
  0x6a   : > { %p1093_p10 = scmp.ne.s32.totalorder %s1402_s10, %s1092_s20  ;;  %s1097_s29 = sshll.u32 %s1188_s15, 4  ;;  %s1098_s29 = int_to_ptr.vmem [resolvable:$false] %s1097_s29 }
  0x6b   : > { %s1099_s12 = scalar_lea.vmem %s1098_s29, 256  ;;  %p1100_p12 = scmp.lt.s32.totalorder %s1402_s10, %s1098_s29 }
  0x6c   : > { %p1095_p3 = pnand %p1093_p10, %p1079_p9  ;;  %p1101_p1 = scmp.lt.s32.totalorder %s1099_s12, %s1092_s20 }
  0x6e   : > { %p1096_p7 = pneg %p1095_p3  ;;  %p1102_p2 = por %p1101_p1, %p1100_p12 }
  0x70   : > { %p1103_p4 = pnand %p1102_p2, %p1096_p7 }
  0x72   : > { %1106 = shalt.err (!%p1103_p4)
}
  0x73   : > { %940 = dma.hbm_to_vmem [thread:$0]  (!%p1398_p11), %s1396_s23, 128, %s1402_s10, %s270_s14  }
  0x74   : > { %p1550_p0 = scmp.ne.s32.totalorder %s1544_s9, 0 }
  0x75   : > { %s1432_s8 = sand.u32 (!%p1550_p0), 1, %s1173_s25   ;;  %p1551_p9 = scmp.ne.s32.totalorder (!%p1550_p0), %s1541_s30, 0 }
  0x76   : > { %289 = sbr.rel (%p1550_p0) target bundleno = 800 (0x320), region = 48  ;;  %s733_s17 = sshll.u32 (!%p1550_p0), %s1432_s8, 3 }
  0x77   : > { %s292_s21 = scalar_lea.sflag (!%p1550_p0), [#allocation3], %s1432_s8  ;;  %s295_s16 = scalar_lea.vmem (!%p1550_p0), [#allocation2], %s733_s17 }
  0x7d   : > { %1152 = dma.done.wait (%p1551_p9), %s292_s21, 128  }
  0x7e   : > { %1154 = vsyncadd (%p1551_p9), %s292_s21, 4294967168  ;;  %p1552_p11 = scmp.eq.s32.totalorder %s1254_s28, 0 }
  0x80   : > { %1156 = dma.done.wait (%p1552_p11), [#allocation6], 2304   ;;  %p1553_p8 = pmov %p1552_p11 }
  0x82   : > { %1158 = vsyncadd (%p1553_p8), [#allocation6], 4294964992  ;;  %p1554_p13 = pmov %p1553_p8 }
  0x83   : > { %p1555_p6 = pmov %p1553_p8 }
  0x84   : > { %1160 = dma.done.wait (%p1554_p13), [#allocation9], 2048  }
  0x85   : > { %1162 = vsyncadd (%p1555_p6), [#allocation9], 4294965248  ;;  %v1189_v0 = vmov 0.0|0.0   ;;  %vm1190_vm0 = vmmov 0   ;;  %v1191_v1 = vmov 0.0   ;;  %v339_v2 = vld [vmem:[#allocation5] sm:$0xff] }
  0x86   : > { %860 = vmatprep.subr.bf16.mxu0 %v1189_v0  ;;  %787 = vmatprep.mubr.msk.f32.mxu0 %vm1190_vm0, %v1191_v1  ;;  %v340_v3 = vld [vmem:[#allocation5 + $0x8] sm:$0xff]  ;;  %v423_v5 = vld [vmem:[#allocation7] sm:$0xff]  ;;  %v424_v6 = vld [vmem:[#allocation7 + $0x8] sm:$0xff]  ;;  %vm348_vm1 = vcmask 130048   ;;  %s743_s13 = sshll.u32 %s1254_s28, 7  ;;  %s337_s20 = scalar_lea.vmem [#allocation10], %s733_s17 }
  0x87   : > { %863 = vmatprep.subr.bf16.mxu1 %v1189_v0  ;;  %822 = vmatprep.mubr.msk.f32.mxu1 %vm1190_vm0, %v1191_v1  ;;  %v861_v4 = vpack.c.bf16 %v340_v3, %v339_v2  ;;  %v425_v7 = vld [vmem:[#allocation7 + $0x10] sm:$0xff]  ;;  %v864_v8 = vpack.c.bf16 %v424_v6, %v423_v5  ;;  %v426_v9 = vld [vmem:[#allocation7 + $0x18] sm:$0xff]  ;;  %v338_v10 = vld [vmem:[%s295_s16] sm:$0xff]  ;;  %s625_s15 = sshll.u32 %s337_s20, 4  ;;  %s1485_s21 = scalar_lea.hbm %s1536_s7, %s743_s13  ;;  %s1487_s15 = int_to_ptr.vmem [resolvable:$true] %s625_s15 }
  0x88   : > { %v867_v11 = vpack.c.bf16 %v426_v9, %v425_v7  ;;  %v427_v12 = vld [vmem:[#allocation7 + $0x20] sm:$0xff]  ;;  %v428_v13 = vld [vmem:[#allocation7 + $0x28] sm:$0xff]  ;;  %v429_v15 = vld [vmem:[#allocation7 + $0x30] sm:$0xff]  ;;  %s612_s16 = scalar_lea.sflag [#allocation4], %s1432_s8  ;;  %s1107_s30 = scalar_lea.vmem %s1487_s15, 128 }
  0x89   : > { %862 = vmatpush3.bf16.msra.mxu0 %v861_v4  ;;  %865 = vmatpush3.bf16.msra.mxu1 %v864_v8  ;;  %v870_v14 = vpack.c.bf16 %v428_v13, %v427_v12  ;;  %v430_v16 = vld [vmem:[#allocation7 + $0x38] sm:$0xff]  ;;  %v431_v18 = vld [vmem:[#allocation7 + $0x40] sm:$0xff]  ;;  %v432_v19 = vld [vmem:[#allocation7 + $0x48] sm:$0xff]  ;;  %p1108_p10 = scmp.ne.s32.totalorder %s1487_s15, %s1107_s30  ;;  %s1192_s28 = smov [#allocation10]  }
  0x8a   : > { %887 = vmatprep.subr.bf16.mxu0 %v1189_v0  ;;  %866 = vmatprep.subr.bf16.mxu1 %v1189_v0  ;;  %v873_v17 = vpack.c.bf16 %v430_v16, %v429_v15  ;;  %v876_v20 = vpack.c.bf16 %v432_v19, %v431_v18  ;;  %v433_v21 = vld [vmem:[#allocation7 + $0x50] sm:$0xff]  ;;  %v434_v22 = vld [vmem:[#allocation7 + $0x58] sm:$0xff]  ;;  %v435_v24 = vld [vmem:[#allocation7 + $0x60] sm:$0xff]  ;;  %s1111_s17 = sshll.u32 %s1192_s28, 4  ;;  %s1112_s17 = int_to_ptr.vmem [resolvable:$false] %s1111_s17 }
  0x8b   : > { %v879_v23 = vpack.c.bf16 %v434_v22, %v433_v21  ;;  %v436_v25 = vld [vmem:[#allocation7 + $0x68] sm:$0xff]  ;;  %v437_v27 = vld [vmem:[#allocation7 + $0x70] sm:$0xff]  ;;  %v438_v28 = vld [vmem:[#allocation7 + $0x78] sm:$0xff]  ;;  %p1109_p3 = pnand %p1108_p10, %p1387_p5  ;;  %s1113_s9 = scalar_lea.vmem %s1112_s17, 256 }
  0x8c   : > { %788 = vmatmul.mubr.msk.f32.vlgmr.msra.gmra.mrb[0].mxu0 %vm348_vm1, %v338_v10  ;;  %v882_v26 = vpack.c.bf16 %v436_v25, %v435_v24  ;;  %v885_v29 = vpack.c.bf16 %v438_v28, %v437_v27  ;;  %v517_v30 = vld [vmem:[#allocation8] sm:$0xff]  ;;  %v518_v31 = vld [vmem:[#allocation8 + $0x8] sm:$0xff]  ;;  %v519_v32 = vld [vmem:[#allocation8 + $0x10] sm:$0xff]  ;;  %p1114_p12 = scmp.lt.s32.totalorder %s1487_s15, %s1112_s17  ;;  %p1115_p1 = scmp.lt.s32.totalorder %s1113_s9, %s1107_s30 }
  0x8d   : > { %857 = vmatprep.mubr.msk.f32.mxu0 %vm1190_vm0, %v1191_v1  ;;  %868 = vmatpush3.bf16.msra.mxu1 %v867_v11  ;;  %v888_v33 = vpack.c.bf16 %v518_v31, %v517_v30  ;;  %v520_v34 = vld [vmem:[#allocation8 + $0x18] sm:$0xff]  ;;  %v521_v36 = vld [vmem:[#allocation8 + $0x20] sm:$0xff]  ;;  %v522_v37 = vld [vmem:[#allocation8 + $0x28] sm:$0xff]  ;;  %p1110_p7 = pneg %p1109_p3 }
  0x8e   : > { %869 = vmatprep.subr.bf16.mxu1 %v1189_v0  ;;  %v891_v35 = vpack.c.bf16 %v520_v34, %v519_v32  ;;  %v894_v38 = vpack.c.bf16 %v522_v37, %v521_v36  ;;  %v523_v39 = vld [vmem:[#allocation8 + $0x30] sm:$0xff]  ;;  %v524_v40 = vld [vmem:[#allocation8 + $0x38] sm:$0xff]  ;;  %v525_v42 = vld [vmem:[#allocation8 + $0x40] sm:$0xff]  ;;  %p1116_p2 = por %p1115_p1, %p1114_p12 }
  0x8f   : > { %889 = vmatpush3.bf16.msra.mxu0 %v888_v33  ;;  %v897_v41 = vpack.c.bf16 %v524_v40, %v523_v39  ;;  %v526_v43 = vld [vmem:[#allocation8 + $0x48] sm:$0xff]  ;;  %v527_v45 = vld [vmem:[#allocation8 + $0x50] sm:$0xff]  ;;  %v528_v46 = vld [vmem:[#allocation8 + $0x58] sm:$0xff] }
  0x90   : > { %890 = vmatprep.subr.bf16.mxu0 %v1189_v0  ;;  %v900_v44 = vpack.c.bf16 %v526_v43, %v525_v42  ;;  %v903_v47 = vpack.c.bf16 %v528_v46, %v527_v45  ;;  %v529_v48 = vld [vmem:[#allocation8 + $0x60] sm:$0xff]  ;;  %v530_v49 = vld [vmem:[#allocation8 + $0x68] sm:$0xff]  ;;  %v531_v56 = vld [vmem:[#allocation8 + $0x70] sm:$0xff]  ;;  %p1117_p4 = pnand %p1116_p2, %p1110_p7 }
  0x91   : > { %871 = vmatpush3.bf16.msra.mxu1 %v870_v14  ;;  %v906_v50 = vpack.c.bf16 %v530_v49, %v529_v48  ;;  %v738_v51 = vld [vmem:[%s1531_s2] ss:$0 sm:$0xff]  ;;  %v532_v57 = vld [vmem:[#allocation8 + $0x78] sm:$0xff] }
  0x92   : > { %872 = vmatprep.subr.bf16.mxu1 %v1189_v0  ;;  %v909_v58 = vpack.c.bf16 %v532_v57, %v531_v56  ;;  %v740_v59 = vld [vmem:[%s1533_s4] ss:$0 sm:$0xff] }
  0x93   : > { %892 = vmatpush3.bf16.msra.mxu0 %v891_v35 }
  0x94   : > { %893 = vmatprep.subr.bf16.mxu0 %v1189_v0 }
  0x95   : > { %874 = vmatpush3.bf16.msra.mxu1 %v873_v17 }
  0x96   : > { %875 = vmatprep.subr.bf16.mxu1 %v1189_v0 }
  0x97   : > { %895 = vmatpush3.bf16.msra.mxu0 %v894_v38 }
  0x98   : > { %896 = vmatprep.subr.bf16.mxu0 %v1189_v0 }
  0x99   : > { %877 = vmatpush3.bf16.msra.mxu1 %v876_v20 }
  0x9a   : > { %878 = vmatprep.subr.bf16.mxu1 %v1189_v0 }
  0x9b   : > { %898 = vmatpush3.bf16.msra.mxu0 %v897_v41 }
  0x9c   : > { %899 = vmatprep.subr.bf16.mxu0 %v1189_v0 }
  0x9d   : > { %880 = vmatpush3.bf16.msra.mxu1 %v879_v23 }
  0x9e   : > { %881 = vmatprep.subr.bf16.mxu1 %v1189_v0 }
  0x9f   : > { %901 = vmatpush3.bf16.msra.mxu0 %v900_v44 }
  0xa0   : > { %902 = vmatprep.subr.bf16.mxu0 %v1189_v0 }
  0xa1   : > { %883 = vmatpush3.bf16.msra.mxu1 %v882_v26 }
  0xa2   : > { %884 = vmatprep.subr.bf16.mxu1 %v1189_v0 }
  0xa3   : > { %904 = vmatpush3.bf16.msra.mxu0 %v903_v47 }
  0xa4   : > { %905 = vmatprep.subr.bf16.mxu0 %v1189_v0 }
  0xa5   : > { %886 = vmatpush3.bf16.msra.mxu1 %v885_v29 }
  0xa7   : > { %907 = vmatpush3.bf16.msra.mxu0 %v906_v50 }
  0xa8   : > { %908 = vmatprep.subr.bf16.mxu0 %v1189_v0  ;;  %v741_v0 = vld [vmem:[%s1535_s6] ss:$0 sm:$0xff] }
  0xab   : > { %910 = vmatpush3.bf16.msra.mxu0 %v909_v58 }
 0x15f   : > { %v418_v52 = vpop.f32.mrb[0].mxu0 }
 0x160   : > { %v419_v53 = vadd.f32 %v738_v51, %v418_v52  ;;  %v789_v54 = vpop.f32.mrb[1].mxu0 }
 0x162   : > { %v422_v55 = vmax.f32 %v419_v53, 0.0 }
 0x164   : > { %823 = vmatmul.mubr.f32.vlgmr.msra.gmra.mrb[0].mxu1 %v422_v55 }
 0x237   : > { %v512_v60 = vpop.f32.mrb[0].mxu1 }
 0x238   : > { %v513_v61 = vadd.f32 %v740_v59, %v512_v60  ;;  %v824_v62 = vpop.f32.mrb[1].mxu1 }
 0x23a   : > { %v516_v63 = vmax.f32 %v513_v61, 0.0 }
 0x23c   : > { %858 = vmatmul.mubr.f32.vlgmr.msra.gmra.mrb[2].mxu0 %v516_v63 }
 0x30f   : > { %v606_v1 = vpop.f32.mrb[2].mxu0 }
 0x310   : > { %v607_v2 = vadd.f32 %v741_v0, %v606_v1  ;;  %v859_v3 = vpop.f32.mrb[3].mxu0 }
 0x312   : > { %610 = vst [vmem:[%s337_s20] sm:$0xff] %v607_v2 }
 0x313   : > { %1120 = shalt.err (!%p1117_p4)
}
 0x314   : > { %s1121_s8 = scalar_lea.hbm %s1485_s21, 128  ;;  %s1125_s11 = scalar_lea.hbm %s1536_s7, 256 }
 0x315   : > { %p1122_p0 = scmp.ne.s32.totalorder %s1485_s21, %s1121_s8  ;;  %p1126_p8 = scmp.lt.u32.totalorder %s1485_s21, %s1536_s7 }
 0x316   : > { %p1127_p13 = scmp.lt.u32.totalorder %s1125_s11, %s1121_s8  ;;  %p1129_p10 = scmp.lt.u32.totalorder %s1121_s8, %s1485_s21 }
 0x317   : > { %p1123_p9 = pnand %p1122_p0, %p1387_p5 }
 0x318   : > { %p1128_p6 = por %p1127_p13, %p1126_p8 }
 0x319   : > { %p1124_p11 = pneg %p1123_p9 }
 0x31a   : > { %p1130_p3 = por %p1129_p10, %p1128_p6 }
 0x31c   : > { %p1131_p7 = pnand %p1130_p3, %p1124_p11 }
 0x31e   : > { %1134 = shalt.err (!%p1131_p7)
}
 0x31f   : > { %925 = dma.vmem_to_hbm [thread:$0]  (%p1387_p5), %s1487_s15, 128, %s1485_s21, %s612_s16  }
 0x320 PF: > { %s1556_s20 = sld [smem:[#allocation15_spill]]  ;;  %s637_s29 = sand.u32 1, %s1169_s24  }
 0x321   : > { %p1558_p1 = scmp.ge.s32.totalorder %s1181_s27, 2  ;;  %s638_s12 = scalar_lea.sflag [#allocation4], %s637_s29 }
 0x326   : > { %p1557_p12 = scmp.ne.s32.totalorder %s1556_s20, 0 }
 0x328   : > { %p942_p2 = pnand %p1558_p1, %p1557_p12 }
 0x32a   : > { %1164 = dma.done.wait (!%p942_p2), %s638_s12, 128  }
 0x32b   : > { %1166 = vsyncadd (!%p942_p2), %s638_s12, 4294967168  ;;  %p22_p4 = scmp.ge.s32.totalorder %s1373_s22, 4   ;;  %s1559_s24 = smov %s1173_s25 }
 0x32c   : > { %s1560_s25 = smov %s1177_s26  ;;  %s1561_s26 = smov %s1383_s18 }
 0x32d   : > { %s1562_s27 = smov %s1373_s22  ;;  %24 = sbr.rel (!%p22_p4) target bundleno = 7 (0x7), region = 105 }
 0x334   :  { %643 = vsyncpa [#allocation3], 1 }
 0x335   :  { %645 = vsyncpa [#allocation3 + $0x1], 1 }
 0x336   :  { %646 = vsyncpa [#allocation6], 1 }
 0x337   :  { %647 = vsyncpa [#allocation9], 1 }
 0x338   :  { %648 = vsyncpa [#allocation4], 1 }
 0x339   :  { %650 = vsyncpa [#allocation4 + $0x1], 1 }

</bundles_post_ra>
